<compile_context>
chip_gen: v5e
topology: v5e:2x2
jax: 0.10.0
libtpu: 0.0.40
codegen_flags: <defaults>
</compile_context>

<pallas_src>
from functools import partial

import jax
import jax.numpy as jnp
from jax.experimental import pallas as pl
from jax.experimental.pallas import tpu as pltpu

# ---- sizes (small, consistent with MyPoseHand(inp_neurons=...)) -------------
B = 2            # batch
F_IN = 256       # inp_neurons (module default is 1536; small test size)
H1 = 128         # base_layer hidden 1
H2 = 128         # base_layer hidden 2 (-> base features)
HB = 64          # per-branch hidden width
HA_W = 5 * HB    # fused stage-A head width (320)
NCOMPS = 45      # theta : MANO pose components
NBETA = 10       # beta  : MANO shape params
NPOSE = NCOMPS + 3   # tsa_poses = [global rot | theta]
NVERTS = 128     # (real MANO: 778)
NJOINTS = 16     # (real MANO: 21)
NFACES = 224     # (real MANO: 1538)

# packed head-slab column layout (lane axis of the (B, 128) heads output)
ROT_OFF = 0                       # rot   : 3   lanes 0:3
THETA_OFF = 3                     # theta : 45  lanes 3:48   -> [rot|theta] = tsa_poses
BETA_OFF = NPOSE                  # beta  : 10  lanes 48:58
SCALE_OFF = BETA_OFF + NBETA      # scale : 1   lane  58
TRANS_OFF = SCALE_OFF + 1         # trans : 3   lanes 59:62
HEAD_PAD = 128                    # lane-dense heads slab width
JOINT_PAD = 128                   # joints slab width (3*NJOINTS=48 used, rest zero)
VERT_W = 3 * NVERTS               # 384, vertex-major interleaved (x0,y0,z0,x1,...)
BIG_W = HEAD_PAD + VERT_W + JOINT_PAD   # 640: [heads | verts | joints] columns

# packed bias row layout (one f32 buffer, 128-lane aligned segments)
B1_OFF = 0                        # b1    : 128
B2_OFF = 128                      # b2    : 128
BA_OFF = 256                      # bA    : 320 (segment padded to 384)
BBIG_OFF = 640                    # [bB | templ+bB@dirs | (...)@jreg] : 640
BIAS_W = BBIG_OFF + BIG_W         # 1280

TILE_B_MAX = 256                  # batch tile cap (VMEM is a non-issue at these widths)


# ----------------------------- kernel -----------------------------------------
def fused_kernel(x_ref, w1_ref, w2_ref, wA_ref, wBig_ref, bias_ref,
                 heads_ref, verts_ref, joints_ref):
    # x is bf16 already (cast in wrapper); all accumulation + elementwise in f32.
    x = x_ref[...]                                                          # (T, F_IN)

    b1 = bias_ref[:, B1_OFF:B1_OFF + H1]
    h = jnp.maximum(
        jnp.dot(x, w1_ref[...], preferred_element_type=jnp.float32) + b1, 0.0)

    b2 = bias_ref[:, B2_OFF:B2_OFF + H2]
    base = jnp.maximum(
        jnp.dot(h.astype(jnp.bfloat16), w2_ref[...],
                preferred_element_type=jnp.float32) + b2, 0.0)

    bA = bias_ref[:, BA_OFF:BA_OFF + HA_W]
    hh = jnp.maximum(
        jnp.dot(base.astype(jnp.bfloat16), wA_ref[...],
                preferred_element_type=jnp.float32) + bA, 0.0)              # (T, 320)

    # One wide matmul emits heads, verts and joints at once (pre-multiplied
    # MANO blendshape / joint-regressor weights live inside wBig).
    bBig = bias_ref[:, BBIG_OFF:BBIG_OFF + BIG_W]
    out = jnp.dot(hh.astype(jnp.bfloat16), wBig_ref[...],
                  preferred_element_type=jnp.float32) + bBig                # (T, 640)

    heads_ref[...] = out[:, :HEAD_PAD]
    verts_ref[...] = out[:, HEAD_PAD:HEAD_PAD + VERT_W]
    joints_ref[...] = out[:, HEAD_PAD + VERT_W:]


# ----------------------------- params ------------------------------------------
def init_params(key, use_mean_shape=False):
    def dense(k, fi, fo):
        kw, kb = jax.random.split(k)
        w = jax.random.normal(kw, (fi, fo), jnp.float32) * (fi ** -0.5)
        b = 0.01 * jax.random.normal(kb, (1, fo), jnp.float32)
        return w, b

    keys = jax.random.split(key, 16)
    w1, b1 = dense(keys[0], F_IN, H1)
    w2, b2 = dense(keys[1], H1, H2)

    # 5 regression heads in slab order: rot, theta, beta, scale, trans.
    head_layout = ((ROT_OFF, 3), (THETA_OFF, NCOMPS), (BETA_OFF, NBETA),
                   (SCALE_OFF, 1), (TRANS_OFF, 3))
    wA = jnp.zeros((H2, HA_W), jnp.float32)
    bA = jnp.zeros((1, HA_W), jnp.float32)
    wB = jnp.zeros((HA_W, HEAD_PAD), jnp.float32)   # block-diagonal: no head leakage
    bB = jnp.zeros((1, HEAD_PAD), jnp.float32)
    for i, (off, dim) in enumerate(head_layout):
        wa, ba = dense(keys[2 + 2 * i], H2, HB)
        wb, bb = dense(keys[3 + 2 * i], HB, dim)
        wA = wA.at[:, i * HB:(i + 1) * HB].set(wa)
        bA = bA.at[:, i * HB:(i + 1) * HB].set(ba)
        wB = wB.at[i * HB:(i + 1) * HB, off:off + dim].set(wb)
        bB = bB.at[:, off:off + dim].set(bb)

    # Static use_mean_shape flag folded into the weights (no in-kernel masking):
    # zero beta columns -> beta output is zero and contributes nothing downstream.
    if use_mean_shape:
        wB = wB.at[:, BETA_OFF:BETA_OFF + NBETA].set(0.0)
        bB = bB.at[:, BETA_OFF:BETA_OFF + NBETA].set(0.0)

    # simplified MANO data, packed vertex-major-interleaved (x0,y0,z0,x1,...)
    # TODO(synk): real MANO applies Rodrigues rotations + linear blend skinning;
    # here the pose-dependent deformation is a plain linear blendshape, and the
    # regressed scale/trans are returned but not applied to verts/joints.
    templ3 = 0.1 * jax.random.normal(keys[12], (3, NVERTS), jnp.float32)
    shapedirs = 0.01 * jax.random.normal(keys[13], (3, NBETA, NVERTS), jnp.float32)
    posedirs = 0.01 * jax.random.normal(keys[14], (3, NPOSE, NVERTS), jnp.float32)
    jregT = jax.nn.softmax(
        jax.random.normal(keys[15], (NVERTS, NJOINTS), jnp.float32), axis=0)

    templ = templ3.transpose(1, 0).reshape(1, VERT_W)                 # [0, 3v+c]=t[c,v]
    dirs = jnp.zeros((HEAD_PAD, VERT_W), jnp.float32)                 # rows = head slab
    dirs = dirs.at[:NPOSE].set(posedirs.transpose(1, 2, 0).reshape(NPOSE, VERT_W))
    dirs = dirs.at[BETA_OFF:BETA_OFF + NBETA].set(
        shapedirs.transpose(1, 2, 0).reshape(NBETA, VERT_W))
    # interleaved block-diagonal joint regressor: jreg[3v+c, 3j+c] = jregT[v, j]
    jreg = jnp.kron(jregT, jnp.eye(3, dtype=jnp.float32))             # (3V, 3J)
    jreg = jnp.pad(jreg, ((0, 0), (0, JOINT_PAD - 3 * NJOINTS)))      # (3V, 128)

    # Pre-multiply the MANO path in f32, then cast once to bf16:
    #   heads  = hh @ wB   + bB
    #   verts  = templ + heads @ dirs = hh @ (wB @ dirs) + (templ + bB @ dirs)
    #   joints = verts @ jreg         = hh @ (wB @ dirs @ jreg) + (...) @ jreg
    w_hv = wB @ dirs                                                   # (320, 384)
    v_bias = templ + bB @ dirs                                         # (1, 384)
    w_hj = w_hv @ jreg                                                 # (320, 128)
    j_bias = v_bias @ jreg                                             # (1, 128)
    wBig = jnp.concatenate([wB, w_hv, w_hj], axis=1)                   # (320, 640)
    bBig = jnp.concatenate([bB, v_bias, j_bias], axis=1)               # (1, 640)

    # all biases in one lane-padded f32 row (one DMA instead of six)
    bias = jnp.zeros((1, BIAS_W), jnp.float32)
    bias = bias.at[:, B1_OFF:B1_OFF + H1].set(b1)
    bias = bias.at[:, B2_OFF:B2_OFF + H2].set(b2)
    bias = bias.at[:, BA_OFF:BA_OFF + HA_W].set(bA)
    bias = bias.at[:, BBIG_OFF:BBIG_OFF + BIG_W].set(bBig)

    faces = (jnp.arange(NFACES * 3, dtype=jnp.int32) % NVERTS).reshape(NFACES, 3)

    return {
        "w1": w1.astype(jnp.bfloat16),
        "w2": w2.astype(jnp.bfloat16),
        "wA": wA.astype(jnp.bfloat16),
        "wBig": wBig.astype(jnp.bfloat16),
        "bias": bias,
        "faces": faces,
    }


# ----------------------------- wrapper ------------------------------------------
_WEIGHT_ORDER = ("w1", "w2", "wA", "wBig", "bias")


def _round_up(n, m):
    return ((n + m - 1) // m) * m


def my_hand_decoder(features, params):
    bq, fin = features.shape
    # adaptive batch tile: fill the MXU M-dim at real batch sizes, keep a grid of
    # >=2 blocks when possible so v7x's second TensorCore participates.
    bp8 = _round_up(bq, 8)
    tile_b = min(TILE_B_MAX, bp8)
    bp = _round_up(bq, tile_b)

    x = features.astype(jnp.bfloat16)               # halve the activation DMA bytes
    if bp != bq:
        x = jnp.pad(x, ((0, bp - bq), (0, 0)))

    in_specs = [pl.BlockSpec((tile_b, fin), lambda i: (i, 0))]
    in_specs += [pl.BlockSpec(params[name].shape, lambda i: (0, 0))
                 for name in _WEIGHT_ORDER]

    heads, verts_slab, joints_slab = pl.pallas_call(
        fused_kernel,
        grid=(bp // tile_b,),
        in_specs=in_specs,
        out_specs=(
            pl.BlockSpec((tile_b, HEAD_PAD), lambda i: (i, 0)),
            pl.BlockSpec((tile_b, VERT_W), lambda i: (i, 0)),
            pl.BlockSpec((tile_b, JOINT_PAD), lambda i: (i, 0)),
        ),
        out_shape=(
            jax.ShapeDtypeStruct((bp, HEAD_PAD), jnp.float32),
            jax.ShapeDtypeStruct((bp, VERT_W), jnp.float32),
            jax.ShapeDtypeStruct((bp, JOINT_PAD), jnp.float32),
        ),
        compiler_params=pltpu.CompilerParams(
            dimension_semantics=("parallel",)),      # batch blocks shard over TCs
    )(x, *[params[n] for n in _WEIGHT_ORDER])

    # slice the packed lane-dense head slab back into PyTorch-convention tensors
    heads = heads[:bq]
    rot = heads[:, ROT_OFF:ROT_OFF + 3]
    theta = heads[:, THETA_OFF:THETA_OFF + NCOMPS]
    beta = heads[:, BETA_OFF:BETA_OFF + NBETA]
    scale = heads[:, SCALE_OFF:SCALE_OFF + 1]
    trans = heads[:, TRANS_OFF:TRANS_OFF + 3]
    tsa_poses = heads[:, :NPOSE]                     # [rot | theta] by column layout

    # vertex-major-interleaved slabs -> free-view reshapes (no transpose)
    verts = verts_slab[:bq].reshape(bq, NVERTS, 3)
    joints = joints_slab[:bq, :3 * NJOINTS].reshape(bq, NJOINTS, 3)
    faces = params["faces"]                                                  # (F, 3)

    return joints, verts, faces, theta, beta, scale, trans, rot, tsa_poses


# ----------------------------- main ---------------------------------------------
if __name__ == "__main__":
    key = jax.random.PRNGKey(0)
    kx, kp = jax.random.split(key)
    params = init_params(kp, use_mean_shape=False)
    features = jax.random.normal(kx, (B, F_IN), jnp.float32)

    outs = jax.jit(lambda f: my_hand_decoder(f, params))(features)
    outs = jax.block_until_ready(outs)

    joints, verts, faces, theta, beta, scale, trans, rot, tsa_poses = outs
    assert joints.shape == (B, NJOINTS, 3)
    assert verts.shape == (B, NVERTS, 3)
    assert faces.shape == (NFACES, 3)
    assert theta.shape == (B, NCOMPS)
    assert beta.shape == (B, NBETA)
    assert scale.shape == (B, 1)
    assert trans.shape == (B, 3)
    assert rot.shape == (B, 3)
    assert tsa_poses.shape == (B, NPOSE)
    print("KERNEL_OK")
</pallas_src>

<mosaic_0001>
module attributes {stable_mosaic.version = 11 : i64} {
  func.func @fused_kernel(%arg0: i32, %arg1: memref<8x256xbf16, #tpu.memory_space<vmem>>, %arg2: memref<256x128xbf16, #tpu.memory_space<vmem>>, %arg3: memref<128x128xbf16, #tpu.memory_space<vmem>>, %arg4: memref<128x320xbf16, #tpu.memory_space<vmem>>, %arg5: memref<320x640xbf16, #tpu.memory_space<vmem>>, %arg6: memref<1x1280xf32, #tpu.memory_space<vmem>>, %arg7: memref<8x128xf32, #tpu.memory_space<vmem>>, %arg8: memref<8x384xf32, #tpu.memory_space<vmem>>, %arg9: memref<8x128xf32, #tpu.memory_space<vmem>>) attributes {dimension_semantics = [#tpu.dimension_semantics<parallel>], iteration_bounds = array<i64: 1>, scalar_prefetch = 0 : i64, scratch_operands = 0 : i64, tpu.core_type = #tpu.core_type<tc>, window_params = [{transform_indices = @transform_0, window_bounds = array<i64: 8, 256>}, {pipeline_mode = #tpu.pipeline_mode<synchronous>, transform_indices = @transform_1, window_bounds = array<i64: 256, 128>}, {pipeline_mode = #tpu.pipeline_mode<synchronous>, transform_indices = @transform_2, window_bounds = array<i64: 128, 128>}, {pipeline_mode = #tpu.pipeline_mode<synchronous>, transform_indices = @transform_3, window_bounds = array<i64: 128, 320>}, {pipeline_mode = #tpu.pipeline_mode<synchronous>, transform_indices = @transform_4, window_bounds = array<i64: 320, 640>}, {pipeline_mode = #tpu.pipeline_mode<synchronous>, transform_indices = @transform_5, window_bounds = array<i64: 1, 1280>}, {transform_indices = @transform_6, window_bounds = array<i64: 8, 128>}, {transform_indices = @transform_7, window_bounds = array<i64: 8, 384>}, {transform_indices = @transform_8, window_bounds = array<i64: 8, 128>}]} {
    %c0 = arith.constant 0 : index
    %c0_0 = arith.constant 0 : index
    %0 = vector.load %arg1[%c0, %c0_0] : memref<8x256xbf16, #tpu.memory_space<vmem>>, vector<8x256xbf16>
    %c0_1 = arith.constant 0 : index
    %c0_2 = arith.constant 0 : index
    %1 = vector.load %arg6[%c0_1, %c0_2] : memref<1x1280xf32, #tpu.memory_space<vmem>>, vector<1x128xf32>
    %c0_3 = arith.constant 0 : index
    %c0_4 = arith.constant 0 : index
    %2 = vector.load %arg2[%c0_3, %c0_4] : memref<256x128xbf16, #tpu.memory_space<vmem>>, vector<256x128xbf16>
    %cst = arith.constant dense<0.000000e+00> : vector<8x128xf32>
    %3 = tpu.matmul %0, %2, %cst {dimension_numbers = #tpu.dot_dimension_numbers<[1], [0], [0], [1], [0, 0, 1, 1], [], []>} : vector<8x256xbf16>, vector<256x128xbf16>, vector<8x128xf32> -> vector<8x128xf32>
    %4 = vector.broadcast %1 : vector<1x128xf32> to vector<8x128xf32>
    %5 = arith.addf %3, %4 : vector<8x128xf32>
    %cst_5 = arith.constant 0.000000e+00 : f32
    %6 = vector.broadcast %cst_5 : f32 to vector<8x128xf32>
    %7 = arith.maximumf %5, %6 : vector<8x128xf32>
    %c0_6 = arith.constant 0 : index
    %c128 = arith.constant 128 : index
    %8 = vector.load %arg6[%c0_6, %c128] : memref<1x1280xf32, #tpu.memory_space<vmem>>, vector<1x128xf32>
    %9 = arith.truncf %7 : vector<8x128xf32> to vector<8x128xbf16>
    %c0_7 = arith.constant 0 : index
    %c0_8 = arith.constant 0 : index
    %10 = vector.load %arg3[%c0_7, %c0_8] : memref<128x128xbf16, #tpu.memory_space<vmem>>, vector<128x128xbf16>
    %cst_9 = arith.constant dense<0.000000e+00> : vector<8x128xf32>
    %11 = tpu.matmul %9, %10, %cst_9 {dimension_numbers = #tpu.dot_dimension_numbers<[1], [0], [0], [1], [0, 0, 1, 1], [], []>} : vector<8x128xbf16>, vector<128x128xbf16>, vector<8x128xf32> -> vector<8x128xf32>
    %12 = vector.broadcast %8 : vector<1x128xf32> to vector<8x128xf32>
    %13 = arith.addf %11, %12 : vector<8x128xf32>
    %cst_10 = arith.constant 0.000000e+00 : f32
    %14 = vector.broadcast %cst_10 : f32 to vector<8x128xf32>
    %15 = arith.maximumf %13, %14 : vector<8x128xf32>
    %c0_11 = arith.constant 0 : index
    %c256 = arith.constant 256 : index
    %16 = vector.load %arg6[%c0_11, %c256] : memref<1x1280xf32, #tpu.memory_space<vmem>>, vector<1x320xf32>
    %17 = arith.truncf %15 : vector<8x128xf32> to vector<8x128xbf16>
    %c0_12 = arith.constant 0 : index
    %c0_13 = arith.constant 0 : index
    %18 = vector.load %arg4[%c0_12, %c0_13] : memref<128x320xbf16, #tpu.memory_space<vmem>>, vector<128x320xbf16>
    %cst_14 = arith.constant dense<0.000000e+00> : vector<8x320xf32>
    %19 = tpu.matmul %17, %18, %cst_14 {dimension_numbers = #tpu.dot_dimension_numbers<[1], [0], [0], [1], [0, 0, 1, 1], [], []>} : vector<8x128xbf16>, vector<128x320xbf16>, vector<8x320xf32> -> vector<8x320xf32>
    %20 = vector.broadcast %16 : vector<1x320xf32> to vector<8x320xf32>
    %21 = arith.addf %19, %20 : vector<8x320xf32>
    %cst_15 = arith.constant 0.000000e+00 : f32
    %22 = vector.broadcast %cst_15 : f32 to vector<8x320xf32>
    %23 = arith.maximumf %21, %22 : vector<8x320xf32>
    %c0_16 = arith.constant 0 : index
    %c640 = arith.constant 640 : index
    %24 = vector.load %arg6[%c0_16, %c640] : memref<1x1280xf32, #tpu.memory_space<vmem>>, vector<1x640xf32>
    %25 = arith.truncf %23 : vector<8x320xf32> to vector<8x320xbf16>
    %c0_17 = arith.constant 0 : index
    %c0_18 = arith.constant 0 : index
    %26 = vector.load %arg5[%c0_17, %c0_18] : memref<320x640xbf16, #tpu.memory_space<vmem>>, vector<320x640xbf16>
    %cst_19 = arith.constant dense<0.000000e+00> : vector<8x640xf32>
    %27 = tpu.matmul %25, %26, %cst_19 {dimension_numbers = #tpu.dot_dimension_numbers<[1], [0], [0], [1], [0, 0, 1, 1], [], []>} : vector<8x320xbf16>, vector<320x640xbf16>, vector<8x640xf32> -> vector<8x640xf32>
    %28 = vector.broadcast %24 : vector<1x640xf32> to vector<8x640xf32>
    %29 = arith.addf %27, %28 : vector<8x640xf32>
    %30 = vector.extract_strided_slice %29 {offsets = [0, 0], sizes = [8, 128], strides = [1, 1]} : vector<8x640xf32> to vector<8x128xf32>
    %c0_20 = arith.constant 0 : index
    %c0_21 = arith.constant 0 : index
    %31 = vector.load %arg7[%c0_20, %c0_21] : memref<8x128xf32, #tpu.memory_space<vmem>>, vector<8x128xf32>
    tpu.vector_store %arg7[%c0_20, %c0_21], %30 {strides = array<i32>} : memref<8x128xf32, #tpu.memory_space<vmem>>, vector<8x128xf32>,
    %32 = vector.extract_strided_slice %29 {offsets = [0, 128], sizes = [8, 384], strides = [1, 1]} : vector<8x640xf32> to vector<8x384xf32>
    %c0_22 = arith.constant 0 : index
    %c0_23 = arith.constant 0 : index
    %33 = vector.load %arg8[%c0_22, %c0_23] : memref<8x384xf32, #tpu.memory_space<vmem>>, vector<8x384xf32>
    tpu.vector_store %arg8[%c0_22, %c0_23], %32 {strides = array<i32>} : memref<8x384xf32, #tpu.memory_space<vmem>>, vector<8x384xf32>,
    %34 = vector.extract_strided_slice %29 {offsets = [0, 512], sizes = [8, 128], strides = [1, 1]} : vector<8x640xf32> to vector<8x128xf32>
    %c0_24 = arith.constant 0 : index
    %c0_25 = arith.constant 0 : index
    %35 = vector.load %arg9[%c0_24, %c0_25] : memref<8x128xf32, #tpu.memory_space<vmem>>, vector<8x128xf32>
    tpu.vector_store %arg9[%c0_24, %c0_25], %34 {strides = array<i32>} : memref<8x128xf32, #tpu.memory_space<vmem>>, vector<8x128xf32>,
    return
  }
  func.func @transform_0(%arg0: i32) -> (i32, i32) {
    %c0_i32 = arith.constant 0 : i32
    %c0_i32_0 = arith.constant 0 : i32
    return %arg0, %c0_i32 : i32, i32
  }
  func.func @transform_1(%arg0: i32) -> (i32, i32) {
    %c0_i32 = arith.constant 0 : i32
    %c0_i32_0 = arith.constant 0 : i32
    %c0_i32_1 = arith.constant 0 : i32
    return %c0_i32, %c0_i32_0 : i32, i32
  }
  func.func @transform_2(%arg0: i32) -> (i32, i32) {
    %c0_i32 = arith.constant 0 : i32
    %c0_i32_0 = arith.constant 0 : i32
    %c0_i32_1 = arith.constant 0 : i32
    return %c0_i32, %c0_i32_0 : i32, i32
  }
  func.func @transform_3(%arg0: i32) -> (i32, i32) {
    %c0_i32 = arith.constant 0 : i32
    %c0_i32_0 = arith.constant 0 : i32
    %c0_i32_1 = arith.constant 0 : i32
    return %c0_i32, %c0_i32_0 : i32, i32
  }
  func.func @transform_4(%arg0: i32) -> (i32, i32) {
    %c0_i32 = arith.constant 0 : i32
    %c0_i32_0 = arith.constant 0 : i32
    %c0_i32_1 = arith.constant 0 : i32
    return %c0_i32, %c0_i32_0 : i32, i32
  }
  func.func @transform_5(%arg0: i32) -> (i32, i32) {
    %c0_i32 = arith.constant 0 : i32
    %c0_i32_0 = arith.constant 0 : i32
    %c0_i32_1 = arith.constant 0 : i32
    return %c0_i32, %c0_i32_0 : i32, i32
  }
  func.func @transform_6(%arg0: i32) -> (i32, i32) {
    %c0_i32 = arith.constant 0 : i32
    %c0_i32_0 = arith.constant 0 : i32
    return %arg0, %c0_i32 : i32, i32
  }
  func.func @transform_7(%arg0: i32) -> (i32, i32) {
    %c0_i32 = arith.constant 0 : i32
    %c0_i32_0 = arith.constant 0 : i32
    return %arg0, %c0_i32 : i32, i32
  }
  func.func @transform_8(%arg0: i32) -> (i32, i32) {
    %c0_i32 = arith.constant 0 : i32
    %c0_i32_0 = arith.constant 0 : i32
    return %arg0, %c0_i32 : i32, i32
  }
}

</mosaic_0001>

<bundles_post_ra>
// kernel: _lambda_.1
= control target key start
LH: loop header
LB: loop body
LE: loop exit
PB: predicated region body
PF: predicated region fallthrough
CT: control target
= control target key end

     0   :  { %14 = vsyncpa [#allocation3], 0  ;;  %s2407_s0 = inlined_call_operand.vmem [shape: bf16[8,256], index: 0, kind: input, shape index: {}]   ;;  %s2408_s1 = inlined_call_operand.hbm [shape: bf16[256,128], index: 1, kind: input, shape index: {}]   ;;  %s2409_s2 = inlined_call_operand.hbm [shape: bf16[128,128], index: 2, kind: input, shape index: {}]   ;;  %s2410_s3 = inlined_call_operand.hbm [shape: bf16[128,320], index: 3, kind: input, shape index: {}]   ;;  %s2411_s4 = inlined_call_operand.hbm [shape: bf16[320,640], index: 4, kind: input, shape index: {}]   ;;  %s2412_s5 = inlined_call_operand.vmem [shape: f32[1,1280], index: 5, kind: input, shape index: {}]   ;;  %s2413_s6 = inlined_call_operand.vmem [shape: f32[8,128], index: 6, kind: output, shape index: {0}]   ;;  %s2414_s7 = inlined_call_operand.vmem [shape: f32[8,384], index: 7, kind: output, shape index: {1}]   ;;  %s2415_s8 = inlined_call_operand.vmem [shape: f32[8,128], index: 8, kind: output, shape index: {2}]  }
   0x1   :  { %15 = vsyncpa [#allocation5], 0 }
   0x2   :  { %16 = vsyncpa [#allocation8], 0  ;;  %s36_s29 = sshll.u32 %s2409_s2, 4  ;;  %s2284_s30 = smov [#allocation4]   ;;  %s37_s29 = int_to_ptr.hbm [resolvable:$true] %s36_s29 }
   0x3   :  { %s38_s9 = sshll.u32 %s2284_s30, 4  ;;  %s23_s12 = sshll.u32 %s2408_s1, 4  ;;  %s39_s9 = int_to_ptr.vmem [resolvable:$true] %s38_s9  ;;  %s24_s12 = int_to_ptr.hbm [resolvable:$true] %s23_s12 }
   0x4   :  { %s2285_s13 = smov 64   ;;  %s2286_s14 = smov 4  }
   0x5   :  { %44 = dma.hbm_to_vmem [thread:$0]  %s37_s29, 1024, %s39_s9, [#allocation5], %s2285_s13, %s2285_s13, %s2286_s14  }
   0x6   :  { %s2287_s15 = smov [#allocation2]   ;;  %s49_s19 = sshll.u32 %s2410_s3, 4  ;;  %s50_s19 = int_to_ptr.hbm [resolvable:$true] %s49_s19 }
   0x7   :  { %s25_s16 = sshll.u32 %s2287_s15, 4  ;;  %s2288_s2 = smov [#allocation6]   ;;  %s26_s16 = int_to_ptr.vmem [resolvable:$true] %s25_s16 }
   0x8   :  { %31 = dma.hbm_to_vmem [thread:$0]  %s24_s12, 2048, %s26_s16, [#allocation3], %s2285_s13, %s2285_s13, %s2286_s14  }
   0x9   :  { %s51_s20 = sshll.u32 %s2288_s2, 4  ;;  %s62_s1 = sshll.u32 %s2411_s4, 4  ;;  %s52_s20 = int_to_ptr.vmem [resolvable:$true] %s51_s20  ;;  %s63_s1 = int_to_ptr.hbm [resolvable:$true] %s62_s1 }
   0xa   :  { %s2289_s23 = smov 192   ;;  %s2290_s24 = smov 12  }
   0xb   :  { %57 = dma.hbm_to_vmem [thread:$0]  %s50_s19, 3072, %s52_s20, [#allocation5], %s2289_s23, %s2289_s23, %s2290_s24  }
   0xc   :  { %s2291_s25 = smov [#allocation7]   ;;  %s2292_s27 = smov 320  }
   0xd   :  { %s64_s26 = sshll.u32 %s2291_s25, 4  ;;  %s2293_s28 = smov 20   ;;  %s65_s26 = int_to_ptr.vmem [resolvable:$true] %s64_s26 }
   0xe   :  { %70 = dma.hbm_to_vmem [thread:$0]  %s63_s1, 12800, %s65_s26, [#allocation8], %s2292_s27, %s2292_s27, %s2293_s28  }
   0xf   :  { %2278 = dma.done.wait [#allocation3], 2048  }
  0x10   :  { %2279 = vsyncadd [#allocation3], 4294965248 }
  0x11   :  { %2280 = dma.done.wait [#allocation5], 4096  }
  0x12   :  { %2281 = vsyncadd [#allocation5], 4294963200 }
  0x13   :  { %2282 = dma.done.wait [#allocation8], 12800  }
  0x14   :  { %2283 = vsyncadd [#allocation8], 4294954496  ;;  %v2029_v0 = vld [vmem:[#allocation2 + $0x38] sm:$0xff]  ;;  %v2028_v2 = vld [vmem:[#allocation2 + $0x30] sm:$0xff]  ;;  %vm1206_vm0 = vcmask 523264  }
  0x15   :  { %v2037_v1 = vld [vmem:[#allocation2 + $0x78] sm:$0xff]  ;;  %230 = vmatpush.bf16.msra.mxu0 %v2029_v0  ;;  %v2036_v3 = vld [vmem:[#allocation2 + $0x70] sm:$0xff]  ;;  %v2027_v5 = vld [vmem:[#allocation2 + $0x28] sm:$0xff] }
  0x16   :  { %243 = vmatpush.bf16.msra.mxu1 %v2037_v1  ;;  %v2045_v4 = vld [vmem:[#allocation4 + $0x38] sm:$0xff]  ;;  %v2035_v6 = vld [vmem:[#allocation2 + $0x68] sm:$0xff]  ;;  %v2044_v7 = vld [vmem:[#allocation4 + $0x30] sm:$0xff] }
  0x17   :  { %326 = vmatpush.bf16.msra.mxu2 %v2045_v4  ;;  %v2026_v8 = vld [vmem:[#allocation2 + $0x20] sm:$0xff]  ;;  %v2043_v10 = vld [vmem:[#allocation4 + $0x28] sm:$0xff]  ;;  %v2025_v11 = vld [vmem:[#allocation2 + $0x18] sm:$0xff] }
  0x18   :  { %v2034_v9 = vld [vmem:[#allocation2 + $0x60] sm:$0xff]  ;;  %v2033_v12 = vld [vmem:[#allocation2 + $0x58] sm:$0xff]  ;;  %v2024_v14 = vld [vmem:[#allocation2 + $0x10] sm:$0xff] }
  0x19   :  { %231 = vmatpush.bf16.msra.mxu0 %v2028_v2  ;;  %v2042_v13 = vld [vmem:[#allocation4 + $0x20] sm:$0xff]  ;;  %v2032_v15 = vld [vmem:[#allocation2 + $0x50] sm:$0xff]  ;;  %v2041_v16 = vld [vmem:[#allocation4 + $0x18] sm:$0xff] }
  0x1a   :  { %244 = vmatpush.bf16.msra.mxu1 %v2036_v3  ;;  %v2023_v17 = vld [vmem:[#allocation2 + $0x8] sm:$0xff]  ;;  %v90_v19 = vld [vmem:[%s2407_s0] sm:$0xff]  ;;  %v2040_v20 = vld [vmem:[#allocation4 + $0x10] sm:$0xff] }
  0x1b   :  { %327 = vmatpush.bf16.msra.mxu2 %v2044_v7  ;;  %v2031_v18 = vld [vmem:[#allocation2 + $0x48] sm:$0xff]  ;;  %v128_v21 = vunpack.c.l.b16 %v90_v19  ;;  %v129_v22 = vunpack.c.h.b16 %v90_v19  ;;  %v2022_v23 = vld [vmem:[#allocation2] sm:$0xff]  ;;  %v2068_v30 = vld [vmem:[#allocation6 + $0xb0] sm:$0xf0] }
  0x1c   :  { %v2030_v24 = vld [vmem:[#allocation2 + $0x40] sm:$0xff]  ;;  %v2039_v27 = vld [vmem:[#allocation4 + $0x8] sm:$0xff]  ;;  %v1609_v33 = vld [vmem:[#allocation6 + $0xb4] sm:$0xf0] }
  0x1d   :  { %232 = vmatpush.bf16.msra.mxu0 %v2027_v5  ;;  %v130_v25 = vpack.c.b16 %v128_v21, %v128_v21  ;;  %v131_v26 = vpack.c.b16 %v129_v22, %v129_v22  ;;  %v2038_v28 = vld [vmem:[#allocation4] sm:$0xff]  ;;  %v1607_v29 = vld [vmem:[#allocation6 + $0xa8] sm:$0xf]  ;;  %v2067_v31 = vld [vmem:[#allocation6 + $0xac] sm:$0xf] }
  0x1e   :  { %245 = vmatpush.bf16.msra.mxu1 %v2035_v6  ;;  %v1608_v32 = vor.u32 %v2068_v30, %v1607_v29  ;;  %v1615_v34 = vld [vmem:[#allocation6 + $0xb0] sm:$0xf]  ;;  %v2069_v35 = vld [vmem:[#allocation6 + $0xb8] sm:$0xf0]  ;;  %v1612_v36 = vor.u32 %v2067_v31, %v1609_v33  ;;  %v2064_v40 = vld [vmem:[#allocation6 + $0x94] sm:$0xf] }
  0x1f   :  { %328 = vmatpush.bf16.msra.mxu2 %v2043_v10  ;;  %v1616_v37 = vor.u32 %v2069_v35, %v1615_v34  ;;  %v1595_v38 = vld [vmem:[#allocation6 + $0x90] sm:$0xf]  ;;  %v2065_v39 = vld [vmem:[#allocation6 + $0x98] sm:$0xf0]  ;;  %v1597_v42 = vld [vmem:[#allocation6 + $0x9c] sm:$0xf0] }
  0x20   :  { %509 = vmatpush.bf16.msra.mxu3 %v1608_v32  ;;  %v1596_v41 = vor.u32 %v2065_v39, %v1595_v38  ;;  %v1603_v43 = vld [vmem:[#allocation6 + $0x98] sm:$0xf]  ;;  %v2066_v44 = vld [vmem:[#allocation6 + $0xa0] sm:$0xf0]  ;;  %v1600_v45 = vor.u32 %v2064_v40, %v1597_v42  ;;  %v2061_v49 = vld [vmem:[#allocation6 + $0x7c] sm:$0xf] }
  0x21   :  { %233 = vmatpush.bf16.msra.mxu0 %v2026_v8  ;;  %v1604_v46 = vor.u32 %v2066_v44, %v1603_v43  ;;  %v1583_v47 = vld [vmem:[#allocation6 + $0x78] sm:$0xf]  ;;  %v2062_v48 = vld [vmem:[#allocation6 + $0x80] sm:$0xf0]  ;;  %v1585_v50 = vld [vmem:[#allocation6 + $0x84] sm:$0xf0] }
  0x22   :  { %246 = vmatpush.bf16.msra.mxu1 %v2034_v9  ;;  %v1591_v51 = vld [vmem:[#allocation6 + $0x80] sm:$0xf]  ;;  %v2063_v52 = vld [vmem:[#allocation6 + $0x88] sm:$0xf0]  ;;  %v1584_v53 = vor.u32 %v2062_v48, %v1583_v47  ;;  %v1588_v54 = vor.u32 %v2061_v49, %v1585_v50  ;;  %v2058_v58 = vld [vmem:[#allocation6 + $0x64] sm:$0xf] }
  0x23   :  { %329 = vmatpush.bf16.msra.mxu2 %v2042_v13  ;;  %v1592_v55 = vor.u32 %v2063_v52, %v1591_v51  ;;  %v1571_v56 = vld [vmem:[#allocation6 + $0x60] sm:$0xf]  ;;  %v2059_v57 = vld [vmem:[#allocation6 + $0x68] sm:$0xf0]  ;;  %v1573_v59 = vld [vmem:[#allocation6 + $0x6c] sm:$0xf0] }
  0x24   :  { %510 = vmatpush.bf16.msra.mxu3 %v1596_v41  ;;  %v1579_v60 = vld [vmem:[#allocation6 + $0x68] sm:$0xf]  ;;  %v2060_v61 = vld [vmem:[#allocation6 + $0x70] sm:$0xf0]  ;;  %v1572_v62 = vor.u32 %v2059_v57, %v1571_v56  ;;  %v1576_v63 = vor.u32 %v2058_v58, %v1573_v59  ;;  %v2055_v3 = vld [vmem:[#allocation6 + $0x4c] sm:$0xf] }
  0x25   :  { %234 = vmatpush.bf16.msra.mxu0 %v2025_v11  ;;  %v1580_v0 = vor.u32 %v2060_v61, %v1579_v60  ;;  %v1559_v1 = vld [vmem:[#allocation6 + $0x48] sm:$0xf]  ;;  %v2056_v2 = vld [vmem:[#allocation6 + $0x50] sm:$0xf0]  ;;  %v1561_v4 = vld [vmem:[#allocation6 + $0x54] sm:$0xf0] }
  0x26   :  { %247 = vmatpush.bf16.msra.mxu1 %v2033_v12  ;;  %v1567_v5 = vld [vmem:[#allocation6 + $0x50] sm:$0xf]  ;;  %v2057_v6 = vld [vmem:[#allocation6 + $0x58] sm:$0xf0]  ;;  %v1560_v7 = vor.u32 %v2056_v2, %v1559_v1  ;;  %v1564_v8 = vor.u32 %v2055_v3, %v1561_v4  ;;  %v2052_v12 = vld [vmem:[#allocation6 + $0x34] sm:$0xf] }
  0x27   :  { %330 = vmatpush.bf16.msra.mxu2 %v2041_v16  ;;  %v1568_v9 = vor.u32 %v2057_v6, %v1567_v5  ;;  %v1547_v10 = vld [vmem:[#allocation6 + $0x30] sm:$0xf]  ;;  %v2053_v11 = vld [vmem:[#allocation6 + $0x38] sm:$0xf0]  ;;  %v1549_v13 = vld [vmem:[#allocation6 + $0x3c] sm:$0xf0] }
  0x28   :  { %511 = vmatpush.bf16.msra.mxu3 %v1584_v53  ;;  %v1548_v16 = vor.u32 %v2053_v11, %v1547_v10  ;;  %v2050_v29 = vld [vmem:[#allocation6 + $0x20] sm:$0xf0]  ;;  %v2049_v30 = vld [vmem:[#allocation6 + $0x1c] sm:$0xf]  ;;  %v1537_v32 = vld [vmem:[#allocation6 + $0x24] sm:$0xf0] }
  0x29   :  { %235 = vmatpush.bf16.msra.mxu0 %v2024_v14  ;;  %v1555_v14 = vld [vmem:[#allocation6 + $0x38] sm:$0xf]  ;;  %v1543_v33 = vld [vmem:[#allocation6 + $0x20] sm:$0xf]  ;;  %v2051_v34 = vld [vmem:[#allocation6 + $0x28] sm:$0xf0]  ;;  %v1540_v35 = vor.u32 %v2049_v30, %v1537_v32 }
  0x2a   :  { %248 = vmatpush.bf16.msra.mxu1 %v2032_v15  ;;  %v2054_v15 = vld [vmem:[#allocation6 + $0x40] sm:$0xf0]  ;;  %v2047_v38 = vld [vmem:[#allocation6 + $0x8] sm:$0xf0]  ;;  %v1525_v41 = vld [vmem:[#allocation6 + $0xc] sm:$0xf0] }
  0x2b   :  { %331 = vmatpush.bf16.msra.mxu2 %v2040_v20  ;;  %v1556_v19 = vor.u32 %v2054_v15, %v1555_v14  ;;  %v2046_v39 = vld [vmem:[#allocation6 + $0x4] sm:$0xf]  ;;  %v1531_v42 = vld [vmem:[#allocation6 + $0x8] sm:$0xf]  ;;  %v2048_v43 = vld [vmem:[#allocation6 + $0x10] sm:$0xf0] }
  0x2c   :  { %512 = vmatpush.bf16.msra.mxu3 %v1572_v62  ;;  %v1528_v44 = vor.u32 %v2046_v39, %v1525_v41  ;;  %v2107_v47 = vld [vmem:[#allocation7 + $0x128] sm:$0xf0]  ;;  %v1739_v48 = vld [vmem:[#allocation7 + $0xf0] sm:$0xf]  ;;  %v2102_v50 = vld [vmem:[#allocation7 + $0x100] sm:$0xf0] }
  0x2d   :  { %236 = vmatpush.bf16.msra.mxu0 %v2023_v17  ;;  %v2180_v17 = vld [vmem:[%s2412_s5] ss:$0 sm:$0xff]  ;;  %v1919_v51 = vld [vmem:[#allocation7 + $0x258] sm:$0xf]  ;;  %v2147_v52 = vld [vmem:[#allocation7 + $0x268] sm:$0xf0] }
  0x2e   :  { %249 = vmatpush.bf16.msra.mxu1 %v2031_v18  ;;  %v1552_v18 = vor.u32 %v2052_v12, %v1549_v13  ;;  %v1999_v53 = vld [vmem:[#allocation7 + $0x2f8] sm:$0xf]  ;;  %v2097_v56 = vld [vmem:[#allocation7 + $0xd8] sm:$0xf0]  ;;  %v1920_v57 = vor.u32 %v2147_v52, %v1919_v51  ;;  %v2167_v58 = vld [vmem:[#allocation7 + $0x308] sm:$0xf0] }
  0x2f   :  { %332 = vmatpush.bf16.msra.mxu2 %v2039_v27  ;;  %v2000_v59 = vor.u32 %v2167_v58, %v1999_v53  ;;  %v1899_v60 = vld [vmem:[#allocation7 + $0x230] sm:$0xf]  ;;  %v2142_v61 = vld [vmem:[#allocation7 + $0x240] sm:$0xf0]  ;;  %v1879_v2 = vld [vmem:[#allocation7 + $0x208] sm:$0xf] }
  0x30   :  { %513 = vmatpush.bf16.msra.mxu3 %v1560_v7  ;;  %v1979_v62 = vld [vmem:[#allocation7 + $0x2d0] sm:$0xf]  ;;  %v2137_v3 = vld [vmem:[#allocation7 + $0x218] sm:$0xf0]  ;;  %v1959_v4 = vld [vmem:[#allocation7 + $0x2a8] sm:$0xf] }
  0x31   :  { %237 = vmatpush.bf16.msra.mxu0 %v2022_v23  ;;  %v2157_v6 = vld [vmem:[#allocation7 + $0x2b8] sm:$0xf0]  ;;  %v2092_v10 = vld [vmem:[#allocation7 + $0xb0] sm:$0xf0]  ;;  %v1880_v12 = vor.u32 %v2137_v3, %v1879_v2  ;;  %v1859_v13 = vld [vmem:[#allocation7 + $0x1e0] sm:$0xf] }
  0x32   :  { %250 = vmatpush.bf16.msra.mxu1 %v2030_v24  ;;  %v2105_v7 = vld [vmem:[#allocation7 + $0x11c] sm:$0xf]  ;;  %v1960_v14 = vor.u32 %v2157_v6, %v1959_v4  ;;  %v2132_v15 = vld [vmem:[#allocation7 + $0x1f0] sm:$0xf0]  ;;  %v1659_v32 = vld [vmem:[#allocation7 + $0x50] sm:$0xf] }
  0x33   :  { %333 = vmatpush.bf16.msra.mxu2 %v2038_v28  ;;  %v1535_v28 = vld [vmem:[#allocation6 + $0x18] sm:$0xf]  ;;  %v2085_v41 = vld [vmem:[#allocation7 + $0x7c] sm:$0xf]  ;;  %v2080_v51 = vld [vmem:[#allocation7 + $0x54] sm:$0xf] }
  0x34   :  { %238 = vmatmul.bf16.vlgmr.msra.gmra.mxu0 %v130_v25  ;;  %514 = vmatpush.bf16.msra.mxu3 %v1548_v16  ;;  %v1536_v31 = vor.u32 %v2050_v29, %v1535_v28  ;;  %v2100_v16 = vld [vmem:[#allocation7 + $0xf4] sm:$0xf]  ;;  %v1839_v28 = vld [vmem:[#allocation7 + $0x1b8] sm:$0xf]  ;;  %v2127_v29 = vld [vmem:[#allocation7 + $0x1c8] sm:$0xf0] }
  0x35   :  { %251 = vmatmul.bf16.vlgmr.msra.gmra.mxu1 %v131_v26  ;;  %522 = vmatpush.bf16.msrb.mxu0 %v1612_v36  ;;  %v1544_v36 = vor.u32 %v2051_v34, %v1543_v33  ;;  %v2082_v33 = vld [vmem:[#allocation7 + $0x60] sm:$0xf0]  ;;  %v1661_v52 = vld [vmem:[#allocation7 + $0x64] sm:$0xf0]  ;;  %v2072_v58 = vld [vmem:[#allocation7 + $0x10] sm:$0xf0] }
  0x36   :  { %535 = vmatpush.bf16.msrb.mxu1 %v1616_v37  ;;  %v1523_v37 = vld [vmem:[#allocation6] sm:$0xf]  ;;  %v2090_v34 = vld [vmem:[#allocation7 + $0xa4] sm:$0xf]  ;;  %v2165_v2 = vld [vmem:[#allocation7 + $0x2fc] sm:$0xf] }
  0x37   :  { %v1524_v40 = vor.u32 %v2047_v38, %v1523_v37  ;;  %v1819_v37 = vld [vmem:[#allocation7 + $0x190] sm:$0xf]  ;;  %v2122_v38 = vld [vmem:[#allocation7 + $0x1a0] sm:$0xf0]  ;;  %v1641_v6 = vld [vmem:[#allocation7 + $0x3c] sm:$0xf0] }
  0x38   :  { %515 = vmatpush.bf16.msra.mxu3 %v1536_v31  ;;  %v2001_v3 = vld [vmem:[#allocation7 + $0x30c] sm:$0xf0] }
  0x39   :  { %523 = vmatpush.bf16.msrb.mxu0 %v1600_v45  ;;  %v1532_v45 = vor.u32 %v2048_v43, %v1531_v42  ;;  %v1681_v42 = vld [vmem:[#allocation7 + $0x8c] sm:$0xf0]  ;;  %v1639_v43 = vld [vmem:[#allocation7 + $0x28] sm:$0xf] }
  0x3a   :  { %536 = vmatpush.bf16.msrb.mxu1 %v1604_v46  ;;  %v1759_v46 = vld [vmem:[#allocation7 + $0x118] sm:$0xf] }
  0x3b   :  { %v1760_v49 = vor.u32 %v2107_v47, %v1759_v46  ;;  %v1820_v46 = vor.u32 %v2122_v38, %v1819_v37  ;;  %v1799_v47 = vld [vmem:[#allocation7 + $0x168] sm:$0xf]  ;;  %v1667_v38 = vld [vmem:[#allocation7 + $0x58] sm:$0xf] }
  0x3c   :  { %516 = vmatpush.bf16.msra.mxu3 %v1524_v40  ;;  %v1660_v40 = vor.u32 %v2082_v33, %v1659_v32  ;;  %v1861_v32 = vld [vmem:[#allocation7 + $0x1f4] sm:$0xf0] }
  0x3d   :  { %524 = vmatpush.bf16.msrb.mxu0 %v1588_v54  ;;  %1210 = vmatpush.bf16.msrb.mxu2 %v1760_v49  ;;  %v1740_v54 = vor.u32 %v2102_v50, %v1739_v48  ;;  %v2117_v48 = vld [vmem:[#allocation7 + $0x178] sm:$0xf0]  ;;  %v1684_v49 = vor.u32 %v2085_v41, %v1681_v42  ;;  %v1841_v42 = vld [vmem:[#allocation7 + $0x1cc] sm:$0xf0] }
  0x3e   :  { %537 = vmatpush.bf16.msrb.mxu1 %v1592_v55  ;;  %v1719_v55 = vld [vmem:[#allocation7 + $0xc8] sm:$0xf]  ;;  %v2125_v41 = vld [vmem:[#allocation7 + $0x1bc] sm:$0xf] }
  0x3f   :  { %v1720_v5 = vor.u32 %v2097_v56, %v1719_v55  ;;  %v2108_v55 = vld [vmem:[#allocation7 + $0x130] sm:$0xf0] }
  0x40   :  { %1223 = vmatpush.bf16.msrb.mxu3 %v1920_v57  ;;  %v1619_v57 = vld [vmem:[#allocation7] sm:$0xf] }
  0x41   :  { %525 = vmatpush.bf16.msrb.mxu0 %v1576_v63  ;;  %v1900_v63 = vor.u32 %v2142_v61, %v1899_v60  ;;  %1211 = vmatpush.bf16.msrb.mxu2 %v1740_v54  ;;  %v1767_v54 = vld [vmem:[#allocation7 + $0x120] sm:$0xf]  ;;  %v1800_v60 = vor.u32 %v2117_v48, %v1799_v47  ;;  %v1921_v61 = vld [vmem:[#allocation7 + $0x26c] sm:$0xf0]  ;;  %v2070_v47 = vld [vmem:[#allocation7 + $0x4] sm:$0xf] }
  0x42   :  { %538 = vmatpush.bf16.msrb.mxu1 %v1580_v0  ;;  %v2162_v0 = vld [vmem:[#allocation7 + $0x2e0] sm:$0xf0]  ;;  %v1768_v4 = vor.u32 %v2108_v55, %v1767_v54  ;;  %v1621_v48 = vld [vmem:[#allocation7 + $0x14] sm:$0xf0] }
  0x43   :  { %v1980_v1 = vor.u32 %v2162_v0, %v1979_v62  ;;  %v1779_v62 = vld [vmem:[#allocation7 + $0x140] sm:$0xf]  ;;  %v1664_v0 = vor.u32 %v2080_v51, %v1661_v52  ;;  %v2078_v51 = vld [vmem:[#allocation7 + $0x40] sm:$0xf0] }
  0x44   :  { %1224 = vmatpush.bf16.msrb.mxu3 %v1900_v63  ;;  %v2112_v63 = vld [vmem:[#allocation7 + $0x150] sm:$0xf0]  ;;  %v2007_v52 = vld [vmem:[#allocation7 + $0x300] sm:$0xf] }
  0x45   :  { %526 = vmatpush.bf16.msrb.mxu0 %v1564_v8  ;;  %v1761_v8 = vld [vmem:[#allocation7 + $0x12c] sm:$0xf0]  ;;  %1212 = vmatpush.bf16.msrb.mxu2 %v1720_v5  ;;  %v2075_v5 = vld [vmem:[#allocation7 + $0x2c] sm:$0xf] }
  0x46   :  { %539 = vmatpush.bf16.msrb.mxu1 %v1568_v9  ;;  %v1699_v9 = vld [vmem:[#allocation7 + $0xa0] sm:$0xf]  ;;  %v1764_v11 = vor.u32 %v2105_v7, %v1761_v8  ;;  %v1747_v8 = vld [vmem:[#allocation7 + $0xf8] sm:$0xf] }
  0x48   :  { %1225 = vmatpush.bf16.msrb.mxu3 %v1880_v12 }
  0x49   :  { %527 = vmatpush.bf16.msrb.mxu0 %v1552_v18  ;;  %v1700_v18 = vor.u32 %v2092_v10, %v1699_v9  ;;  %v2103_v9 = vld [vmem:[#allocation7 + $0x108] sm:$0xf0]  ;;  %v1620_v10 = vor.u32 %v2072_v58, %v1619_v57  ;;  %v1821_v57 = vld [vmem:[#allocation7 + $0x1a4] sm:$0xf0] }
  0x4a   :  { %540 = vmatpush.bf16.msrb.mxu1 %v1556_v19  ;;  %v1939_v19 = vld [vmem:[#allocation7 + $0x280] sm:$0xf] }
  0x4b   :  { %1213 = vmatpush.bf16.msrb.mxu2 %v1700_v18  ;;  %v1644_v18 = vor.u32 %v2075_v5, %v1641_v6  ;;  %v1801_v5 = vld [vmem:[#allocation7 + $0x17c] sm:$0xf0] }
  0x4d   :  { %528 = vmatpush.bf16.msrb.mxu0 %v1540_v35  ;;  %v1701_v35 = vld [vmem:[#allocation7 + $0xb4] sm:$0xf0] }
  0x4e   :  { %541 = vmatpush.bf16.msrb.mxu1 %v1544_v36  ;;  %v1840_v36 = vor.u32 %v2127_v29, %v1839_v28  ;;  %v1704_v39 = vor.u32 %v2090_v34, %v1701_v35  ;;  %v1707_v28 = vld [vmem:[#allocation7 + $0xa8] sm:$0xf]  ;;  %v2093_v29 = vld [vmem:[#allocation7 + $0xb8] sm:$0xf0]  ;;  %v1687_v34 = vld [vmem:[#allocation7 + $0x80] sm:$0xf] }
  0x4f   :  { %v1708_v33 = vor.u32 %v2093_v29, %v1707_v28  ;;  %v2088_v35 = vld [vmem:[#allocation7 + $0x90] sm:$0xf0] }
  0x50   :  { %v1688_v37 = vor.u32 %v2088_v35, %v1687_v34  ;;  %v2143_v34 = vld [vmem:[#allocation7 + $0x248] sm:$0xf0] }
  0x51   :  { %529 = vmatpush.bf16.msrb.mxu0 %v1528_v44  ;;  %v2077_v44 = vld [vmem:[#allocation7 + $0x38] sm:$0xf0] }
  0x52   :  { %542 = vmatpush.bf16.msrb.mxu1 %v1532_v45  ;;  %v2181_v45 = vld [vmem:[%s2412_s5 + $0x1] ss:$0 sm:$0xff]  ;;  %v1640_v50 = vor.u32 %v2077_v44, %v1639_v43  ;;  %v1844_v43 = vor.u32 %v2125_v41, %v1841_v42  ;;  %v2155_v44 = vld [vmem:[#allocation7 + $0x2ac] sm:$0xf]  ;;  %v1769_v41 = vld [vmem:[#allocation7 + $0x134] sm:$0xf0] }
  0x55   :  { %1240 = vmatpush.bf16.msra.mxu0 %v2000_v59  ;;  %v2145_v59 = vld [vmem:[#allocation7 + $0x25c] sm:$0xf] }
  0x56   :  { %1249 = vmatpush.bf16.msra.mxu1 %v1764_v11  ;;  %v1780_v11 = vor.u32 %v2112_v63, %v1779_v62  ;;  %v1924_v12 = vor.u32 %v2145_v59, %v1921_v61  ;;  %v2150_v59 = vld [vmem:[#allocation7 + $0x284] sm:$0xf]  ;;  %v1627_v62 = vld [vmem:[#allocation7 + $0x8] sm:$0xf]  ;;  %v2073_v63 = vld [vmem:[#allocation7 + $0x18] sm:$0xf0] }
  0x59   :  { %1241 = vmatpush.bf16.msra.mxu0 %v1980_v1 }
  0x5d   :  { %1242 = vmatpush.bf16.msra.mxu0 %v1960_v14  ;;  %v2004_v14 = vor.u32 %v2165_v2, %v2001_v3  ;;  %v2163_v2 = vld [vmem:[#allocation7 + $0x2e8] sm:$0xf0] }
  0xb1   :  { %v239_v20 = vpop.f32.mrf.mxu0 }
  0xb2   :  { %v252_v21 = vpop.f32.mrf.mxu1  ;;  %v240_v22 = vadd.f32 %v2180_v17, %v239_v20  ;;  %v1741_v17 = vld [vmem:[#allocation7 + $0x104] sm:$0xf0]  ;;  %v2152_v20 = vld [vmem:[#allocation7 + $0x290] sm:$0xf0] }
  0xb4   :  { %v253_v23 = vadd.f32 %v252_v21, %v240_v22  ;;  %v1744_v21 = vor.u32 %v2100_v16, %v1741_v17  ;;  %v1679_v22 = vld [vmem:[#allocation7 + $0x78] sm:$0xf]  ;;  %v2160_v16 = vld [vmem:[#allocation7 + $0x2d4] sm:$0xf]  ;;  %v1981_v17 = vld [vmem:[#allocation7 + $0x2e4] sm:$0xf0] }
  0xb6   :  { %v256_v24 = vmax.f32 %v253_v23, 0.0  ;;  %v2087_v23 = vld [vmem:[#allocation7 + $0x88] sm:$0xf0]  ;;  %1250 = vmatpush.bf16.msra.mxu1 %v1744_v21  ;;  %v1727_v21 = vld [vmem:[#allocation7 + $0xd0] sm:$0xf] }
  0xb7   :  { %v1680_v31 = vor.u32 %v2087_v23, %v1679_v22  ;;  %v2098_v22 = vld [vmem:[#allocation7 + $0xe0] sm:$0xf0] }
  0xb8   :  { %v258_v25 = vpack.c.bf16 %v256_v24, %v256_v24  ;;  %v2095_v24 = vld [vmem:[#allocation7 + $0xcc] sm:$0xf] }
  0xb9   :  { %v241_v26 = vpop.f32.mrf.mxu0  ;;  %1214 = vmatpush.bf16.msrb.mxu2 %v1680_v31  ;;  %v2130_v31 = vld [vmem:[#allocation7 + $0x1e4] sm:$0xf] }
  0xba   :  { %v254_v27 = vpop.f32.mrf.mxu1  ;;  %334 = vmatmul.bf16.vlgmr.msra.gmra.mxu2 %v258_v25  ;;  %v1860_v25 = vor.u32 %v2132_v15, %v1859_v13  ;;  %v1721_v26 = vld [vmem:[#allocation7 + $0xdc] sm:$0xf0]  ;;  %v2140_v13 = vld [vmem:[#allocation7 + $0x234] sm:$0xf]  ;;  %v1901_v15 = vld [vmem:[#allocation7 + $0x244] sm:$0xf0] }
  0xbb   :  { %v1940_v27 = vor.u32 %v2152_v20, %v1939_v19  ;;  %v1724_v30 = vor.u32 %v2095_v24, %v1721_v26  ;;  %v1748_v20 = vor.u32 %v2103_v9, %v1747_v8  ;;  %v1904_v23 = vor.u32 %v2140_v13, %v1901_v15  ;;  %v1881_v26 = vld [vmem:[#allocation7 + $0x21c] sm:$0xf0]  ;;  %v2158_v8 = vld [vmem:[#allocation7 + $0x2c0] sm:$0xf0]  ;;  %v1947_v13 = vld [vmem:[#allocation7 + $0x288] sm:$0xf] }
  0xbc   :  { %1226 = vmatpush.bf16.msrb.mxu3 %v1860_v25  ;;  %v1984_v24 = vor.u32 %v2160_v16, %v1981_v17  ;;  %v2135_v25 = vld [vmem:[#allocation7 + $0x20c] sm:$0xf]  ;;  %v340_v16 = vld [vmem:[%s2412_s5 + $0x2] sm:$0x7] }
  0xbd   :  { %1243 = vmatpush.bf16.msra.mxu0 %v1940_v27  ;;  %1251 = vmatpush.bf16.msra.mxu1 %v1724_v30  ;;  %v1728_v27 = vor.u32 %v2098_v22, %v1727_v21  ;;  %v1884_v30 = vor.u32 %v2135_v25, %v1881_v26  ;;  %v376_v17 = vperm.slane %v340_v16, 1  ;;  %v1927_v22 = vld [vmem:[#allocation7 + $0x260] sm:$0xf]  ;;  %v2146_v25 = vld [vmem:[#allocation7 + $0x264] sm:$0xf]  ;;  %v375_v28 = vperm.slane %v340_v16, 0 }
  0xbe   :  { %1215 = vmatpush.bf16.msrb.mxu2 %v1660_v40  ;;  %v1929_v26 = vld [vmem:[#allocation7 + $0x274] sm:$0xf0] }
  0xc0   :  { %1227 = vmatpush.bf16.msrb.mxu3 %v1840_v36  ;;  %v1864_v36 = vor.u32 %v2130_v31, %v1861_v32  ;;  %v1932_v32 = vor.u32 %v2146_v25, %v1929_v26  ;;  %v2121_v26 = vld [vmem:[#allocation7 + $0x19c] sm:$0xf] }
  0xc1   :  { %1252 = vmatpush.bf16.msra.mxu1 %v1704_v39  ;;  %v2083_v39 = vld [vmem:[#allocation7 + $0x68] sm:$0xf0] }
  0xc2   :  { %1216 = vmatpush.bf16.msrb.mxu2 %v1640_v50  ;;  %v1668_v40 = vor.u32 %v2083_v39, %v1667_v38  ;;  %v1624_v50 = vor.u32 %v2070_v47, %v1621_v48  ;;  %v1909_v38 = vld [vmem:[#allocation7 + $0x24c] sm:$0xf0] }
  0xc4   :  { %1228 = vmatpush.bf16.msrb.mxu3 %v1820_v46 }
  0xc5   :  { %1253 = vmatpush.bf16.msra.mxu1 %v1684_v49  ;;  %v1647_v49 = vld [vmem:[#allocation7 + $0x30] sm:$0xf] }
  0xc6   :  { %1217 = vmatpush.bf16.msrb.mxu2 %v1620_v10  ;;  %v1648_v54 = vor.u32 %v2078_v51, %v1647_v49  ;;  %v2110_v10 = vld [vmem:[#allocation7 + $0x144] sm:$0xf]  ;;  %v1887_v49 = vld [vmem:[#allocation7 + $0x210] sm:$0xf] }
  0xc8   :  { %1229 = vmatpush.bf16.msrb.mxu3 %v1800_v60  ;;  %v1941_v60 = vld [vmem:[#allocation7 + $0x294] sm:$0xf0] }
  0xc9   :  { %1254 = vmatpush.bf16.msra.mxu1 %v1664_v0  ;;  %v1944_v61 = vor.u32 %v2150_v59, %v1941_v60  ;;  %v1628_v0 = vor.u32 %v2073_v63, %v1627_v62  ;;  %v2161_v59 = vld [vmem:[#allocation7 + $0x2dc] sm:$0xf]  ;;  %v1989_v60 = vld [vmem:[#allocation7 + $0x2ec] sm:$0xf0]  ;;  %v1867_v62 = vld [vmem:[#allocation7 + $0x1e8] sm:$0xf] }
  0xca   :  { %1262 = vmatpush.bf16.msra.mxu2 %v1924_v12  ;;  %v2133_v63 = vld [vmem:[#allocation7 + $0x1f8] sm:$0xf0] }
  0xcc   :  { %1230 = vmatpush.bf16.msrb.mxu3 %v1780_v11  ;;  %v1781_v11 = vld [vmem:[#allocation7 + $0x154] sm:$0xf0] }
  0xcd   :  { %1255 = vmatpush.bf16.msra.mxu1 %v1644_v18  ;;  %v1784_v12 = vor.u32 %v2110_v10, %v1781_v11  ;;  %v377_v18 = vperm.slane %v340_v16, 2  ;;  %v1847_v11 = vld [vmem:[#allocation7 + $0x1c0] sm:$0xf] }
  0xce   :  { %1263 = vmatpush.bf16.msra.mxu2 %v1904_v23  ;;  %v2148_v23 = vld [vmem:[#allocation7 + $0x270] sm:$0xf0] }
  0xd1   :  { %1256 = vmatpush.bf16.msra.mxu1 %v1624_v50  ;;  %v2138_v50 = vld [vmem:[#allocation7 + $0x220] sm:$0xf0] }
  0xd2   :  { %1264 = vmatpush.bf16.msra.mxu2 %v1884_v30  ;;  %v1928_v30 = vor.u32 %v2148_v23, %v1927_v22  ;;  %v1827_v23 = vld [vmem:[#allocation7 + $0x198] sm:$0xf] }
  0xd6   :  { %1265 = vmatpush.bf16.msra.mxu2 %v1864_v36 }
  0xda   :  { %1266 = vmatpush.bf16.msra.mxu2 %v1844_v43 }
 0x13d   :  { %v335_v53 = vpop.f32.mrf.mxu2 }
 0x13e   :  { %v336_v56 = vadd.f32 %v2181_v45, %v335_v53  ;;  %v1961_v45 = vld [vmem:[#allocation7 + $0x2bc] sm:$0xf0]  ;;  %v2168_v53 = vld [vmem:[#allocation7 + $0x310] sm:$0xf0] }
 0x13f   :  { %v1964_v46 = vor.u32 %v2155_v44, %v1961_v45  ;;  %v2008_v55 = vor.u32 %v2168_v53, %v2007_v52  ;;  %v2166_v44 = vld [vmem:[#allocation7 + $0x304] sm:$0xf]  ;;  %v2009_v45 = vld [vmem:[#allocation7 + $0x314] sm:$0xf0]  ;;  %v2136_v52 = vld [vmem:[#allocation7 + $0x214] sm:$0xf] }
 0x140   :  { %v339_v1 = vmax.f32 %v336_v56, 0.0  ;;  %v2120_v56 = vld [vmem:[#allocation7 + $0x194] sm:$0xf]  ;;  %v1889_v53 = vld [vmem:[#allocation7 + $0x224] sm:$0xf0] }
 0x141   :  { %v1824_v58 = vor.u32 %v2120_v56, %v1821_v57  ;;  %v2101_v56 = vld [vmem:[#allocation7 + $0xfc] sm:$0xf]  ;;  %v1749_v57 = vld [vmem:[#allocation7 + $0x10c] sm:$0xf0] }
 0x142   :  { %v341_v7 = vpack.c.bf16 %v339_v1, %v339_v1  ;;  %v1987_v1 = vld [vmem:[#allocation7 + $0x2d8] sm:$0xf] }
 0x143   :  { %1267 = vmatpush.bf16.msra.mxu2 %v1824_v58  ;;  %v1988_v3 = vor.u32 %v2163_v2, %v1987_v1  ;;  %v1888_v58 = vor.u32 %v2138_v50, %v1887_v49  ;;  %v1752_v1 = vor.u32 %v2101_v56, %v1749_v57  ;;  %v2131_v2 = vld [vmem:[#allocation7 + $0x1ec] sm:$0xf]  ;;  %v1787_v49 = vld [vmem:[#allocation7 + $0x148] sm:$0xf]  ;;  %v2113_v50 = vld [vmem:[#allocation7 + $0x158] sm:$0xf0] }
 0x144   :  { %517 = vmatmul.bf16.vlgmr.msra.gmra.mxu3 %v341_v7  ;;  %530 = vmatmul.bf16.vlgmr.msrb.gmra.mxu0 %v341_v7  ;;  %v2109_v56 = vld [vmem:[#allocation7 + $0x138] sm:$0xf0] }
 0x145   :  { %543 = vmatmul.bf16.vlgmr.msrb.gmra.mxu1 %v341_v7  ;;  %v337_v19 = vpop.f32.mrf.mxu2  ;;  %1288 = vmatpush.bf16.msrb.mxu0 %v1768_v4  ;;  %v2115_v4 = vld [vmem:[#allocation7 + $0x16c] sm:$0xf]  ;;  %v1967_v7 = vld [vmem:[#allocation7 + $0x2b0] sm:$0xf] }
 0x146   :  { %1279 = vmatpush.bf16.msra.mxu3 %v2004_v14  ;;  %1318 = vmatpush.bf16.msrb.mxu1 %v2008_v55  ;;  %v1804_v6 = vor.u32 %v2115_v4, %v1801_v5  ;;  %v1968_v9 = vor.u32 %v2158_v8, %v1967_v7  ;;  %v2153_v14 = vld [vmem:[#allocation7 + $0x298] sm:$0xf0]  ;;  %v2012_v55 = vor.u32 %v2166_v44, %v2009_v45  ;;  %v2096_v5 = vld [vmem:[#allocation7 + $0xd4] sm:$0xf]  ;;  %v1669_v44 = vld [vmem:[#allocation7 + $0x6c] sm:$0xf0] }
 0x147   :  { %v1948_v15 = vor.u32 %v2153_v14, %v1947_v13  ;;  %v1992_v4 = vor.u32 %v2161_v59, %v1989_v60  ;;  %v1868_v7 = vor.u32 %v2133_v63, %v1867_v62  ;;  %v2156_v8 = vld [vmem:[#allocation7 + $0x2b4] sm:$0xf]  ;;  %v2126_v14 = vld [vmem:[#allocation7 + $0x1c4] sm:$0xf]  ;;  %v1649_v59 = vld [vmem:[#allocation7 + $0x44] sm:$0xf0]  ;;  %v1788_v60 = vor.u32 %v2113_v50, %v1787_v49 }
 0x148   :  { %1268 = vmatpush.bf16.msra.mxu2 %v1804_v6  ;;  %v1729_v6 = vld [vmem:[#allocation7 + $0xe4] sm:$0xf0]  ;;  %v2139_v62 = vld [vmem:[#allocation7 + $0x228] sm:$0xf0]  ;;  %v1655_v49 = vld [vmem:[#allocation7 + $0x38] sm:$0xf] }
 0x149   :  { %1289 = vmatpush.bf16.msrb.mxu0 %v1748_v20  ;;  %v1732_v13 = vor.u32 %v2096_v5, %v1729_v6  ;;  %v2071_v5 = vld [vmem:[#allocation7 + $0xc] sm:$0xf]  ;;  %v1629_v6 = vld [vmem:[#allocation7 + $0x1c] sm:$0xf0] }
 0x14a   :  { %1280 = vmatpush.bf16.msra.mxu3 %v1984_v24  ;;  %1319 = vmatpush.bf16.msrb.mxu1 %v1988_v3  ;;  %v1869_v3 = vld [vmem:[#allocation7 + $0x1fc] sm:$0xf0]  ;;  %v2079_v50 = vld [vmem:[#allocation7 + $0x48] sm:$0xf0] }
 0x14b   :  { %v1872_v10 = vor.u32 %v2131_v2, %v1869_v3  ;;  %v1755_v2 = vld [vmem:[#allocation7 + $0x100] sm:$0xf]  ;;  %v2104_v3 = vld [vmem:[#allocation7 + $0x110] sm:$0xf0] }
 0x14c   :  { %1269 = vmatpush.bf16.msra.mxu2 %v1784_v12  ;;  %v2128_v12 = vld [vmem:[#allocation7 + $0x1d0] sm:$0xf0] }
 0x14d   :  { %1290 = vmatpush.bf16.msrb.mxu0 %v1728_v27 }
 0x14e   :  { %1281 = vmatpush.bf16.msra.mxu3 %v1964_v46  ;;  %1320 = vmatpush.bf16.msrb.mxu1 %v1968_v9  ;;  %v1969_v9 = vld [vmem:[#allocation7 + $0x2c4] sm:$0xf0] }
 0x14f   :  { %v1972_v16 = vor.u32 %v2156_v8, %v1969_v9  ;;  %v2134_v8 = vld [vmem:[#allocation7 + $0x200] sm:$0xf0]  ;;  %v2015_v9 = vld [vmem:[#allocation7 + $0x308] sm:$0xf] }
 0x151   :  { %1291 = vmatpush.bf16.msrb.mxu0 %v1708_v33  ;;  %v1907_v33 = vld [vmem:[#allocation7 + $0x238] sm:$0xf] }
 0x152   :  { %1282 = vmatpush.bf16.msra.mxu3 %v1944_v61  ;;  %1321 = vmatpush.bf16.msrb.mxu1 %v1948_v15  ;;  %v1908_v43 = vor.u32 %v2143_v34, %v1907_v33  ;;  %v1892_v61 = vor.u32 %v2136_v52, %v1889_v53  ;;  %v1849_v15 = vld [vmem:[#allocation7 + $0x1d4] sm:$0xf0]  ;;  %v1935_v33 = vld [vmem:[#allocation7 + $0x268] sm:$0xf]  ;;  %v2149_v34 = vld [vmem:[#allocation7 + $0x278] sm:$0xf0] }
 0x153   :  { %v1852_v22 = vor.u32 %v2126_v14, %v1849_v15  ;;  %v1789_v53 = vld [vmem:[#allocation7 + $0x15c] sm:$0xf0]  ;;  %v2099_v14 = vld [vmem:[#allocation7 + $0xe8] sm:$0xf0] }
 0x155   :  { %1292 = vmatpush.bf16.msrb.mxu0 %v1688_v37  ;;  %v2141_v37 = vld [vmem:[#allocation7 + $0x23c] sm:$0xf] }
 0x156   :  { %v1912_v48 = vor.u32 %v2141_v37, %v1909_v38  ;;  %v1807_v37 = vld [vmem:[#allocation7 + $0x170] sm:$0xf]  ;;  %v2118_v38 = vld [vmem:[#allocation7 + $0x180] sm:$0xf0] }
 0x157   :  { %v1808_v45 = vor.u32 %v2118_v38, %v1807_v37  ;;  %v2119_v38 = vld [vmem:[#allocation7 + $0x188] sm:$0xf0] }
 0x159   :  { %1293 = vmatpush.bf16.msrb.mxu0 %v1668_v40  ;;  %v2106_v40 = vld [vmem:[#allocation7 + $0x124] sm:$0xf] }
 0x15a   :  { %v1772_v51 = vor.u32 %v2106_v40, %v1769_v41  ;;  %v2116_v40 = vld [vmem:[#allocation7 + $0x174] sm:$0xf]  ;;  %v1809_v41 = vld [vmem:[#allocation7 + $0x184] sm:$0xf0] }
 0x15d   :  { %1294 = vmatpush.bf16.msrb.mxu0 %v1648_v54 }
 0x161   :  { %1295 = vmatpush.bf16.msrb.mxu0 %v1628_v0 }
 0x1c1   :  { %v531_v19 = vpop.f32.mrf.mxu0 }
 0x1c2   :  { %v532_v20 = vadd.f32 %v531_v19, %v376_v17  ;;  %v544_v21 = vpop.f32.mrf.mxu1  ;;  %v2091_v17 = vld [vmem:[#allocation7 + $0xac] sm:$0xf]  ;;  %v1848_v19 = vor.u32 %v2128_v12, %v1847_v11  ;;  %v1756_v11 = vor.u32 %v2104_v3, %v1755_v2  ;;  %v1632_v12 = vor.u32 %v2071_v5, %v1629_v6 }
 0x1c3   :  { %v545_v24 = vadd.f32 %v544_v21, %v377_v18  ;;  %v1709_v18 = vld [vmem:[#allocation7 + $0xbc] sm:$0xf0] }
 0x1c4   :  { %v549_v27 = vmax.f32 %v532_v20, 0.0  ;;  %v2151_v20 = vld [vmem:[#allocation7 + $0x28c] sm:$0xf]  ;;  %v1949_v21 = vld [vmem:[#allocation7 + $0x29c] sm:$0xf0]  ;;  %v1712_v25 = vor.u32 %v2091_v17, %v1709_v18 }
 0x1c5   :  { %v550_v29 = vmax.f32 %v545_v24, 0.0  ;;  %v2123_v24 = vld [vmem:[#allocation7 + $0x1a8] sm:$0xf0]  ;;  %v2129_v18 = vld [vmem:[#allocation7 + $0x1d8] sm:$0xf0] }
 0x1c6   :  { %v2363_v31 = vpack.c.bf16 %v549_v27, %v549_v27  ;;  %v1829_v27 = vld [vmem:[#allocation7 + $0x1ac] sm:$0xf0] }
 0x1c7   :  { %v2365_v35 = vpack.c.bf16 %v550_v29, %v550_v29  ;;  %v518_v36 = vpop.f32.mrf.mxu3  ;;  %v2086_v29 = vld [vmem:[#allocation7 + $0x84] sm:$0xf] }
 0x1c8   :  { %v519_v39 = vadd.f32 %v518_v36, %v375_v28  ;;  %1231 = vmatmul.bf16.vlgmr.msrb.gmra.mxu3 %v2363_v31  ;;  %v1952_v28 = vor.u32 %v2151_v20, %v1949_v21  ;;  %v1832_v36 = vor.u32 %v2121_v26, %v1829_v27  ;;  %v2164_v20 = vld [vmem:[#allocation7 + $0x2f0] sm:$0xf0] }
 0x1c9   :  { %2017 = vmatmul.msk.bf16.vlgmr.msra.gmra.mxu0 %vm1206_vm0, %v2365_v35  ;;  %1301 = vmatpush.bf16.msrb.mxu3 %v1928_v30  ;;  %v533_v42 = vpop.f32.mrf.mxu0  ;;  %v1689_v30 = vld [vmem:[#allocation7 + $0x94] sm:$0xf0]  ;;  %v2124_v27 = vld [vmem:[#allocation7 + $0x1b0] sm:$0xf0] }
 0x1ca   :  { %v548_v46 = vmax.f32 %v519_v39, 0.0  ;;  %v546_v47 = vpop.f32.mrf.mxu1  ;;  %1340 = vmatpush.bf16.msra.mxu0 %v1932_v32  ;;  %v1828_v32 = vor.u32 %v2123_v24, %v1827_v23  ;;  %v1692_v39 = vor.u32 %v2086_v29, %v1689_v30  ;;  %v1936_v42 = vor.u32 %v2149_v34, %v1935_v33  ;;  %v2094_v23 = vld [vmem:[#allocation7 + $0xc0] sm:$0xf0]  ;;  %v2159_v29 = vld [vmem:[#allocation7 + $0x2c8] sm:$0xf0] }
 0x1cb   :  { %v2144_v47 = vld [vmem:[#allocation7 + $0x250] sm:$0xf0]  ;;  %v2089_v33 = vld [vmem:[#allocation7 + $0x98] sm:$0xf0] }
 0x1cc   :  { %v2370_v54 = vpack.c.bf16 %v548_v46, %v548_v46  ;;  %v1915_v46 = vld [vmem:[#allocation7 + $0x240] sm:$0xf] }
 0x1cd   :  { %1302 = vmatpush.bf16.msrb.mxu3 %v1908_v43  ;;  %v2081_v43 = vld [vmem:[#allocation7 + $0x5c] sm:$0xf]  ;;  %v1916_v57 = vor.u32 %v2144_v47, %v1915_v46  ;;  %v1795_v46 = vld [vmem:[#allocation7 + $0x150] sm:$0xf]  ;;  %v2114_v47 = vld [vmem:[#allocation7 + $0x160] sm:$0xf0] }
 0x1ce   :  { %1341 = vmatpush.bf16.msra.mxu0 %v1912_v48  ;;  %1218 = vmatmul.bf16.vlgmr.msrb.gmra.mxu2 %v2370_v54  ;;  %v1812_v48 = vor.u32 %v2116_v40, %v1809_v41  ;;  %v1672_v52 = vor.u32 %v2081_v43, %v1669_v44  ;;  %v2154_v40 = vld [vmem:[#allocation7 + $0x2a0] sm:$0xf0]  ;;  %v2084_v43 = vld [vmem:[#allocation7 + $0x70] sm:$0xf0] }
 0x1cf   :  { %1257 = vmatmul.bf16.vlgmr.msra.gmra.mxu1 %v2370_v54  ;;  %v520_v0 = vpop.f32.mrf.mxu3  ;;  %1327 = vmatpush.bf16.msrb.mxu2 %v1772_v51  ;;  %v2111_v51 = vld [vmem:[#allocation7 + $0x14c] sm:$0xf] }
 0x1d0   :  { %1357 = vmatpush.bf16.msra.mxu1 %v2012_v55  ;;  %v1775_v55 = vld [vmem:[#allocation7 + $0x128] sm:$0xf]  ;;  %v1792_v63 = vor.u32 %v2111_v51, %v1789_v53  ;;  %v1796_v51 = vor.u32 %v2114_v47, %v1795_v46  ;;  %v1635_v53 = vld [vmem:[#allocation7 + $0x10] sm:$0xf] }
 0x1d1   :  { %1303 = vmatpush.bf16.msrb.mxu3 %v1888_v58  ;;  %v2076_v58 = vld [vmem:[#allocation7 + $0x34] sm:$0xf]  ;;  %v1776_v0 = vor.u32 %v2109_v56, %v1775_v55  ;;  %v2074_v55 = vld [vmem:[#allocation7 + $0x20] sm:$0xf0] }
 0x1d2   :  { %1342 = vmatpush.bf16.msra.mxu0 %v1892_v61  ;;  %v1895_v61 = vld [vmem:[#allocation7 + $0x218] sm:$0xf]  ;;  %v1636_v56 = vor.u32 %v2074_v55, %v1635_v53 }
 0x1d3   :  { %1328 = vmatpush.bf16.msrb.mxu2 %v1752_v1  ;;  %v1652_v1 = vor.u32 %v2076_v58, %v1649_v59 }
 0x1d4   :  { %1358 = vmatpush.bf16.msra.mxu1 %v1992_v4  ;;  %v1896_v4 = vor.u32 %v2139_v62, %v1895_v61 }
 0x1d5   :  { %1304 = vmatpush.bf16.msrb.mxu3 %v1868_v7  ;;  %v1875_v7 = vld [vmem:[#allocation7 + $0x1f0] sm:$0xf] }
 0x1d6   :  { %1343 = vmatpush.bf16.msra.mxu0 %v1872_v10  ;;  %v2169_v10 = vld [vmem:[#allocation7 + $0x318] sm:$0xf0]  ;;  %v1876_v15 = vor.u32 %v2134_v8, %v1875_v7 }
 0x1d7   :  { %1329 = vmatpush.bf16.msrb.mxu2 %v1732_v13  ;;  %v1735_v13 = vld [vmem:[#allocation7 + $0xd8] sm:$0xf]  ;;  %v2016_v17 = vor.u32 %v2169_v10, %v2015_v9 }
 0x1d8   :  { %2018 = vmatmul.msk.bf16.vlgmr.msra.gmra.mxu3 %vm1206_vm0, %v2365_v35  ;;  %1359 = vmatpush.bf16.msra.mxu1 %v1972_v16  ;;  %v1855_v16 = vld [vmem:[#allocation7 + $0x1c8] sm:$0xf]  ;;  %v1736_v21 = vor.u32 %v2099_v14, %v1735_v13 }
 0x1d9   :  { %1296 = vmatmul.bf16.vlgmr.msrb.gmra.mxu0 %v2370_v54  ;;  %1305 = vmatpush.bf16.msrb.mxu3 %v1848_v19  ;;  %v1995_v19 = vld [vmem:[#allocation7 + $0x2e0] sm:$0xf]  ;;  %v1856_v24 = vor.u32 %v2129_v18, %v1855_v16 }
 0x1da   :  { %1344 = vmatpush.bf16.msra.mxu0 %v1852_v22  ;;  %v1715_v22 = vld [vmem:[#allocation7 + $0xb0] sm:$0xf]  ;;  %v1996_v26 = vor.u32 %v2164_v20, %v1995_v19 }
 0x1db   :  { %1330 = vmatpush.bf16.msrb.mxu2 %v1712_v25  ;;  %v1835_v25 = vld [vmem:[#allocation7 + $0x1a0] sm:$0xf]  ;;  %v1716_v30 = vor.u32 %v2094_v23, %v1715_v22 }
 0x1dc   :  { %1360 = vmatpush.bf16.msra.mxu1 %v1952_v28  ;;  %v1975_v28 = vld [vmem:[#allocation7 + $0x2b8] sm:$0xf]  ;;  %v1836_v34 = vor.u32 %v2124_v27, %v1835_v25 }
 0x1dd   :  { %1306 = vmatpush.bf16.msrb.mxu3 %v1828_v32  ;;  %v1695_v32 = vld [vmem:[#allocation7 + $0x88] sm:$0xf]  ;;  %v1976_v37 = vor.u32 %v2159_v29, %v1975_v28 }
 0x1de   :  { %1345 = vmatpush.bf16.msra.mxu0 %v1832_v36  ;;  %1270 = vmatmul.bf16.vlgmr.msra.gmra.mxu2 %v2363_v31  ;;  %v1815_v36 = vld [vmem:[#allocation7 + $0x178] sm:$0xf]  ;;  %v1696_v41 = vor.u32 %v2089_v33, %v1695_v32 }
 0x1df   :  { %2019 = vmatmul.msk.bf16.vlgmr.msrb.gmra.mxu1 %vm1206_vm0, %v2365_v35  ;;  %1331 = vmatpush.bf16.msrb.mxu2 %v1692_v39  ;;  %v1955_v39 = vld [vmem:[#allocation7 + $0x290] sm:$0xf]  ;;  %v1816_v44 = vor.u32 %v2119_v38, %v1815_v36 }
 0x1e0   :  { %1379 = vmatpush.bf16.msrb.mxu1 %v1936_v42  ;;  %v1675_v42 = vld [vmem:[#allocation7 + $0x60] sm:$0xf] }
 0x1e1   :  { %1307 = vmatpush.bf16.msrb.mxu3 %v1808_v45  ;;  %v1956_v45 = vor.u32 %v2154_v40, %v1955_v39 }
 0x1e2   :  { %1346 = vmatpush.bf16.msra.mxu0 %v1812_v48  ;;  %v1676_v48 = vor.u32 %v2084_v43, %v1675_v42 }
 0x1e3   :  { %1332 = vmatpush.bf16.msrb.mxu2 %v1672_v52  ;;  %v1656_v52 = vor.u32 %v2079_v50, %v1655_v49 }
 0x1e4   :  { %1380 = vmatpush.bf16.msrb.mxu1 %v1916_v57 }
 0x1e5   :  { %1308 = vmatpush.bf16.msrb.mxu3 %v1788_v60  ;;  %v551_v60 = vld [vmem:[%s2412_s5 + $0x5] sm:$0x1f] }
 0x1e6   :  { %1347 = vmatpush.bf16.msra.mxu0 %v1792_v63  ;;  %v676_v62 = vperm.slane %v551_v60, 0  ;;  %v677_v5 = vperm.slane %v551_v60, 1  ;;  %v678_v14 = vperm.slane %v551_v60, 2  ;;  %v679_v23 = vperm.slane %v551_v60, 3 }
 0x1e7   :  { %1333 = vmatpush.bf16.msrb.mxu2 %v1652_v1  ;;  %v680_v36 = vperm.slane %v551_v60, 4 }
 0x1e8   :  { %1381 = vmatpush.bf16.msrb.mxu1 %v1896_v4  ;;  %1309 = vmatmul.bf16.vlgmr.msrb.gmra.mxu3 %v2363_v31 }
 0x1e9   :  { %1366 = vmatpush.bf16.msra.mxu3 %v1776_v0  ;;  %1348 = vmatmul.bf16.vlgmr.msra.gmra.mxu0 %v2363_v31 }
 0x1eb   :  { %1334 = vmatpush.bf16.msrb.mxu2 %v1632_v12 }
 0x1ec   :  { %1382 = vmatpush.bf16.msrb.mxu1 %v1876_v15 }
 0x1ed   :  { %1367 = vmatpush.bf16.msra.mxu3 %v1756_v11 }
 0x1ee   :  { %1335 = vmatmul.bf16.vlgmr.msrb.gmra.mxu2 %v2370_v54 }
 0x1ef   :  { %1396 = vmatpush.bf16.msra.mxu2 %v2016_v17  ;;  %2020 = vmatmul.msk.bf16.vlgmr.msra.gmra.mxu1 %vm1206_vm0, %v2365_v35 }
 0x1f0   :  { %1383 = vmatpush.bf16.msrb.mxu1 %v1856_v24 }
 0x1f1   :  { %1368 = vmatpush.bf16.msra.mxu3 %v1736_v21 }
 0x1f3   :  { %1397 = vmatpush.bf16.msra.mxu2 %v1996_v26 }
 0x1f4   :  { %1384 = vmatpush.bf16.msrb.mxu1 %v1836_v34 }
 0x1f5   :  { %1369 = vmatpush.bf16.msra.mxu3 %v1716_v30 }
 0x1f7   :  { %1398 = vmatpush.bf16.msra.mxu2 %v1976_v37 }
 0x1f8   :  { %1385 = vmatpush.bf16.msrb.mxu1 %v1816_v44 }
 0x1f9   :  { %1370 = vmatpush.bf16.msra.mxu3 %v1696_v41 }
 0x1fb   :  { %1399 = vmatpush.bf16.msra.mxu2 %v1956_v45 }
 0x1fc   :  { %1386 = vmatpush.bf16.msrb.mxu1 %v1796_v51 }
 0x1fd   :  { %1371 = vmatpush.bf16.msra.mxu3 %v1676_v48 }
 0x1fe   :  { %2021 = vmatmul.msk.bf16.vlgmr.msra.gmra.mxu2 %vm1206_vm0, %v2365_v35 }
 0x1ff   :  { %1387 = vmatmul.bf16.vlgmr.msrb.gmra.mxu1 %v2363_v31 }
 0x201   :  { %1372 = vmatpush.bf16.msra.mxu3 %v1656_v52 }
 0x205   :  { %1373 = vmatpush.bf16.msra.mxu3 %v1636_v56 }
 0x208   :  { %1374 = vmatmul.bf16.vlgmr.msra.gmra.mxu3 %v2370_v54 }
 0x246   :  { %v1245_v57 = vpop.f32.mrf.mxu0 }
 0x24b   :  { %v1232_v58 = vpop.f32.mrf.mxu3 }
 0x24c   :  { %v1258_v59 = vpop.f32.mrf.mxu1 }
 0x24d   :  { %v1259_v8 = vadd.f32 %v1258_v59, %v677_v5 }
 0x24e   :  { %v1247_v61 = vpop.f32.mrf.mxu0 }
 0x251   :  { %v1219_v63 = vpop.f32.mrf.mxu2 }
 0x252   :  { %v1220_v0 = vadd.f32 %v1219_v63, %v676_v62 }
 0x253   :  { %v1234_v1 = vpop.f32.mrf.mxu3 }
 0x254   :  { %v1233_v2 = vadd.f32 %v1232_v58, %v1220_v0  ;;  %v1260_v35 = vpop.f32.mrf.mxu1 }
 0x256   :  { %v1246_v3 = vadd.f32 %v1245_v57, %v1233_v2  ;;  %v1297_v4 = vpop.f32.mrf.mxu0 }
 0x257   :  { %v1298_v17 = vadd.f32 %v1297_v4, %v678_v14 }
 0x258   :  { %1405 = vst [vmem:[%s2413_s6] sm:$0xff] %v1246_v3 }
 0x259   :  { %v1221_v31 = vpop.f32.mrf.mxu2 }
 0x25b   :  { %v1284_v54 = vpop.f32.mrf.mxu3 }
 0x25c   :  { %v1323_v6 = vpop.f32.mrf.mxu1 }
 0x25e   :  { %v1299_v7 = vpop.f32.mrf.mxu0 }
 0x261   :  { %v1271_v9 = vpop.f32.mrf.mxu2 }
 0x262   :  { %v1272_v10 = vadd.f32 %v1271_v9, %v1259_v8 }
 0x263   :  { %v1286_v11 = vpop.f32.mrf.mxu3 }
 0x264   :  { %v1285_v12 = vadd.f32 %v1284_v54, %v1272_v10  ;;  %v1325_v13 = vpop.f32.mrf.mxu1 }
 0x266   :  { %1406 = vst [vmem:[%s2414_s7] sm:$0xff] %v1285_v12  ;;  %v1349_v15 = vpop.f32.mrf.mxu0 }
 0x269   :  { %v1273_v16 = vpop.f32.mrf.mxu2 }
 0x26b   :  { %v1310_v18 = vpop.f32.mrf.mxu3 }
 0x26c   :  { %v1311_v19 = vadd.f32 %v1310_v18, %v1298_v17  ;;  %v1362_v20 = vpop.f32.mrf.mxu1 }
 0x26e   :  { %v1324_v21 = vadd.f32 %v1323_v6, %v1311_v19  ;;  %v1351_v22 = vpop.f32.mrf.mxu0 }
 0x270   :  { %1407 = vst [vmem:[%s2414_s7 + $0x8] sm:$0xff] %v1324_v21 }
 0x271   :  { %v1336_v24 = vpop.f32.mrf.mxu2 }
 0x272   :  { %v1337_v25 = vadd.f32 %v1336_v24, %v679_v23 }
 0x273   :  { %v1312_v26 = vpop.f32.mrf.mxu3 }
 0x274   :  { %v1350_v27 = vadd.f32 %v1349_v15, %v1337_v25  ;;  %v1364_v28 = vpop.f32.mrf.mxu1 }
 0x276   :  { %v1363_v29 = vadd.f32 %v1362_v20, %v1350_v27 }
 0x278   :  { %1408 = vst [vmem:[%s2414_s7 + $0x10] sm:$0xff] %v1363_v29 }
 0x279   :  { %v1338_v30 = vpop.f32.mrf.mxu2 }
 0x27c   :  { %v1388_v32 = vpop.f32.mrf.mxu1 }
 0x281   :  { %v1401_v33 = vpop.f32.mrf.mxu2 }
 0x284   :  { %v1390_v34 = vpop.f32.mrf.mxu1 }
 0x289   :  { %v1403_v39 = vpop.f32.mrf.mxu2 }
 0x28b   :  { %v1375_v37 = vpop.f32.mrf.mxu3 }
 0x28c   :  { %v1376_v38 = vadd.f32 %v1375_v37, %v680_v36 }
 0x28e   :  { %v1389_v40 = vadd.f32 %v1388_v32, %v1376_v38 }
 0x290   :  { %v1402_v41 = vadd.f32 %v1401_v33, %v1389_v40 }
 0x292   :  { %1409 = vst [vmem:[%s2415_s8] sm:$0xff] %v1402_v41 }
 0x293   :  { %v1377_v42 = vpop.f32.mrf.mxu3 }
 0x294   :  { %1422 = vsyncpa [#allocation3], 1 }
 0x295   :  { %1423 = vsyncpa [#allocation5], 1 }
 0x296   :  { %1424 = vsyncpa [#allocation8], 1 }

</bundles_post_ra>
